<compile_context>
chip_gen: v6e
topology: v6e:2x2x1
jax: 0.10.0
libtpu: 0.0.40
codegen_flags: <defaults>
</compile_context>

<pallas_src>
import numpy as np
import jax
import jax.numpy as jnp
from jax.experimental import pallas as pl
from jax.experimental.pallas import tpu as pltpu

CH = 4             # conv input channels (policy_head(channel=4))
H = 4              # forced by BatchNorm1d(4)
W = 4              # forced by Linear(2*16, 16)
OC = 2             # conv output channels
HW = H * W         # 16 spatial positions
HID = OC * HW      # 32 = flattened activation length (Linear input)
CIN = CH * HW      # 64 = flattened input length per board
OUT = 16           # policy logits
EPS = 1e-5

# Packed parameter slab (single resident DMA).  Columns padded to a full lane
# register (128); rows padded to a multiple of 8.
#   rows  0:32 , cols 0:64 -> C_mat   = Wc_big - (P/8) @ Wc_big      (centered conv LHS)
#   rows  0:32 , col  64   -> c_bias  = bias   - (P/8) @ bias
#   rows  0:32 , col  65   -> gamma  (per flat row)
#   rows  0:32 , col  66   -> beta   (per flat row)
#   rows 32:64 , cols 0:32 -> P/8    (BN group-mean selector, pre-scaled)
#   rows 64:80 , cols 0:32 -> Linear weight (16, 32)
#   rows 64:80 , col  64   -> Linear bias
ROW_P = HID                # 32
ROW_LIN = 2 * HID          # 64
SLAB_R = 2 * HID + OUT     # 80
SLAB_C = 128
COL_BIAS = CIN             # 64
COL_GAMMA = CIN + 1        # 65
COL_BETA = CIN + 2         # 66


def _round_up(v, m):
    return -(-v // m) * m


def policy_head_kernel(slab_ref, x_ref, o_ref):
    # ---- unpack the resident parameter slab (constant index_map: one DMA) ----
    c_mat = slab_ref[0:HID, 0:CIN]                          # (32, 64)
    c_bias = slab_ref[0:HID, COL_BIAS:COL_BIAS + 1]         # (32, 1)
    gamma = slab_ref[0:HID, COL_GAMMA:COL_GAMMA + 1]        # (32, 1)
    beta = slab_ref[0:HID, COL_BETA:COL_BETA + 1]           # (32, 1)
    p_scaled = slab_ref[ROW_P:ROW_LIN, 0:HID]               # (32, 32)  == P / 8
    wl = slab_ref[ROW_LIN:SLAB_R, 0:HID]                    # (16, 32)
    bl = slab_ref[ROW_LIN:SLAB_R, COL_BIAS:COL_BIAS + 1]    # (16, 1)

    # x block arrives board-major (TB, 64); keep boards lane-packed by
    # contracting the feature axis with a transposed RHS (fused into the
    # matmul / idle XLU — no wrapper-side HBM transpose pass).
    x = x_ref[...]
    if x.dtype != jnp.float32:        # bf16 activation stream support
        x = x.astype(jnp.float32)

    # ---- Conv2d(CH,2,1) with the BN mean already subtracted ------------------
    # centered[r, b] = conv[r, b] - mean_over_group(r)[b]; row r = oc*16+h*4+w
    # (the row-major Flatten(0) order), group = same h.
    centered = jnp.dot(c_mat, x.T, preferred_element_type=jnp.float32) + c_bias  # (32, TB)

    # ---- BatchNorm1d(4), training mode, per-board batch statistics -----------
    # Two-pass biased variance: var = (1/8) * sum_group centered^2, broadcast
    # back to all 32 rows by the pre-scaled selector matmul.
    var = jnp.dot(p_scaled, centered * centered,
                  preferred_element_type=jnp.float32)                            # (32, TB)
    scale = gamma * jax.lax.rsqrt(var + EPS)
    act = jnp.maximum(centered * scale + beta, 0.0)                              # BN + ReLU

    # ---- Flatten(0) + Linear(32, 16): rows already in flat (oc,h,w) order ----
    logits = jnp.dot(wl, act, preferred_element_type=jnp.float32) + bl           # (16, TB)

    # ---- Softmax over the 16 logits of each board (rows) ---------------------
    # Exact normalization (division) so each column sums to 1 to f32 rounding.
    z = logits - jnp.max(logits, axis=0, keepdims=True)
    e = jnp.exp(z)
    o_ref[...] = e / jnp.sum(e, axis=0, keepdims=True)


def _build_param_slab(params):
    wc = params["conv_w"].reshape(OC, CH).astype(jnp.float32)
    bc = params["conv_b"].reshape(OC).astype(jnp.float32)
    gamma = params["bn_gamma"].reshape(H).astype(jnp.float32)
    beta = params["bn_beta"].reshape(H).astype(jnp.float32)
    wl = params["lin_w"].reshape(OUT, HID).astype(jnp.float32)
    bl = params["lin_b"].reshape(OUT).astype(jnp.float32)

    # Expanded 1x1-conv weight: output row oc*16+p = sum_c wc[oc,c] * x[c*16+p]
    wc_big = jnp.kron(wc, jnp.eye(HW, dtype=jnp.float32))        # (32, 64)
    bias_col = jnp.repeat(bc, HW)                                # (32,) bc[oc]
    gamma_col = jnp.tile(jnp.repeat(gamma, W), OC)               # (32,) gamma[h]
    beta_col = jnp.tile(jnp.repeat(beta, W), OC)                 # (32,) beta[h]

    # BN group selector: rows r, r' in the same group iff same h = (r%16)//4.
    r = jnp.arange(HID)
    chan = (r % HW) // W
    p_mat = (chan[:, None] == chan[None, :]).astype(jnp.float32)  # (32, 32)
    p_scaled = p_mat / float(OC * W)                              # P / 8

    # Fold the BN mean path into the conv matmul (host-side, once).
    c_mat = wc_big - p_scaled @ wc_big
    c_bias = bias_col - p_scaled @ bias_col

    slab = jnp.zeros((SLAB_R, SLAB_C), jnp.float32)
    slab = slab.at[0:HID, 0:CIN].set(c_mat)
    slab = slab.at[0:HID, COL_BIAS].set(c_bias)
    slab = slab.at[0:HID, COL_GAMMA].set(gamma_col)
    slab = slab.at[0:HID, COL_BETA].set(beta_col)
    slab = slab.at[ROW_P:ROW_LIN, 0:HID].set(p_scaled)
    slab = slab.at[ROW_LIN:SLAB_R, 0:HID].set(wl)
    slab = slab.at[ROW_LIN:SLAB_R, COL_BIAS].set(bl)
    return slab


def _pick_block_b(batch):
    """Big lane tiles amortize the ~0.35us/grid-step overhead, but keep >= 2
    grid steps (when the batch allows) so v7x's 'parallel' axis shards over
    both TensorCores.  On v5e/v6e (1 TC) the tile size alone matters."""
    bp = _round_up(batch, 128)
    if bp <= 128:
        return 128
    half = _round_up(bp // 2, 128)
    return max(128, min(512, half))


def policy_head_forward(x, params, block_b=None):
    """x: (B, CH, H, W) float32/bfloat16 -> (B, 16) softmax probabilities.

    Each board uses the module's per-example semantics (its own training-mode
    BatchNorm statistics over the 8 (oc, w) values of each h); the batch only
    amortizes launch/DMA cost.  Ragged B is padded up to a multiple of the
    board tile (padding columns are computed and discarded; they never pollute
    valid columns since every op is column-independent)."""
    B = x.shape[0]
    if block_b is None:
        block_b = _pick_block_b(B)
    nb = -(-B // block_b)
    bp = nb * block_b

    # Boards stay row-major (B, 64): the reshape is a free view, and there is
    # no wrapper-side transpose pass over HBM.  bf16 inputs stream as-is.
    x2 = x.reshape(B, CIN)
    if x2.dtype != jnp.bfloat16 and x2.dtype != jnp.float32:
        x2 = x2.astype(jnp.float32)
    if bp != B:
        x2 = jnp.pad(x2, ((0, bp - B), (0, 0)))

    slab = _build_param_slab(params)

    out = pl.pallas_call(
        policy_head_kernel,
        out_shape=jax.ShapeDtypeStruct((OUT, bp), jnp.float32),
        grid_spec=pltpu.PrefetchScalarGridSpec(
            num_scalar_prefetch=0,
            grid=(nb,),
            in_specs=[
                # parameters: constant index_map -> one DMA, stays resident
                pl.BlockSpec((SLAB_R, SLAB_C), lambda i: (0, 0)),
                # boards for this block, row-major; if xprof shows this DMA
                # still exposed, add pipeline_mode=pl.Buffered(3) here.
                pl.BlockSpec((block_b, CIN), lambda i: (i, 0)),
            ],
            # lane-dense (16, TB) output -> unmasked full-lane stores
            out_specs=pl.BlockSpec((OUT, block_b), lambda i: (0, i)),
        ),
        compiler_params=pltpu.CompilerParams(
            dimension_semantics=("parallel",)),       # v7x: shard batch over both TCs
    )(slab, x2)

    return out[:, :B].T                               # (B, 16); output is 4x
                                                      # smaller than the input stream


def policy_head_reference(x, params):
    """Plain-JAX reference mirroring the PyTorch forward (training-mode BN), vmapped."""
    def single(xb):
        wc = params["conv_w"].reshape(OC, CH)
        conv = jnp.einsum("oc,chw->ohw", wc, xb) + params["conv_b"][:, None, None]
        mean = conv.mean(axis=(0, 2), keepdims=True)
        var = conv.var(axis=(0, 2), keepdims=True)                       # biased
        bn = (conv - mean) / jnp.sqrt(var + EPS)
        bn = bn * params["bn_gamma"][None, :, None] + params["bn_beta"][None, :, None]
        act = jnp.maximum(bn, 0.0)
        flat = act.reshape(-1)                                           # (32,)
        y = params["lin_w"] @ flat + params["lin_b"]                     # (16,)
        return jax.nn.softmax(y, axis=0)
    return jax.vmap(single)(x.astype(jnp.float32))


if __name__ == "__main__":
    key = jax.random.PRNGKey(0)
    k_x, k_cw, k_cb, k_g, k_b, k_lw, k_lb, k_x2 = jax.random.split(key, 8)

    B = 256
    x = jax.random.normal(k_x, (B, CH, H, W), dtype=jnp.float32)

    params = {
        # Conv2d(channel, 2, 1): weight (2, CH, 1, 1) stored squeezed, bias (2,)
        "conv_w": jax.random.normal(k_cw, (OC, CH), dtype=jnp.float32) * 0.5,
        "conv_b": jax.random.normal(k_cb, (OC,), dtype=jnp.float32) * 0.1,
        # BatchNorm1d(4): non-trivial affine to exercise the gamma/beta mapping
        "bn_gamma": 1.0 + 0.2 * jax.random.normal(k_g, (H,), dtype=jnp.float32),
        "bn_beta": 0.1 * jax.random.normal(k_b, (H,), dtype=jnp.float32),
        # Linear(32, 16)
        "lin_w": jax.random.normal(k_lw, (OUT, HID), dtype=jnp.float32) * 0.2,
        "lin_b": jax.random.normal(k_lb, (OUT,), dtype=jnp.float32) * 0.1,
    }

    # --- main f32 path: B=256 -> 2 grid blocks of 128 boards -------------------
    out = jax.block_until_ready(policy_head_forward(x, params))
    ref = jax.block_until_ready(policy_head_reference(x, params))
    assert out.shape == (B, OUT)
    err = float(np.max(np.abs(np.asarray(out) - np.asarray(ref))))
    assert np.allclose(np.asarray(out), np.asarray(ref), atol=1e-3, rtol=1e-3), err
    # exact softmax normalization -> every row sums to 1 to f32 rounding
    assert float(np.max(np.abs(np.asarray(out).sum(axis=1) - 1.0))) < 1e-3

    # --- ragged batch exercises the padding path (B=10 -> one 128-board block) -
    x_small = jax.random.normal(k_x2, (10, CH, H, W), dtype=jnp.float32)
    out_s = jax.block_until_ready(policy_head_forward(x_small, params))
    ref_s = jax.block_until_ready(policy_head_reference(x_small, params))
    assert out_s.shape == (10, OUT)
    assert np.allclose(np.asarray(out_s), np.asarray(ref_s), atol=1e-3, rtol=1e-3)

    # --- bf16 activation stream (producer-side HBM-BW lever): smoke check ------
    out_bf = jax.block_until_ready(policy_head_forward(x.astype(jnp.bfloat16), params))
    assert out_bf.shape == (B, OUT)
    assert np.allclose(np.asarray(out_bf), np.asarray(ref), atol=3e-2)
    assert float(np.max(np.abs(np.asarray(out_bf).sum(axis=1) - 1.0))) < 1e-3

    print("KERNEL_OK")
</pallas_src>

<mosaic_0001>
module attributes {stable_mosaic.version = 11 : i64} {
  func.func @policy_head_kernel(%arg0: i32, %arg1: memref<80x128xf32, #tpu.memory_space<vmem>>, %arg2: memref<128x64xf32, #tpu.memory_space<vmem>>, %arg3: memref<16x128xf32, #tpu.memory_space<vmem>>) attributes {dimension_semantics = [#tpu.dimension_semantics<parallel>], iteration_bounds = array<i64: 2>, scalar_prefetch = 0 : i64, scratch_operands = 0 : i64, tpu.core_type = #tpu.core_type<tc>, window_params = [{pipeline_mode = #tpu.pipeline_mode<synchronous>, transform_indices = @transform_0, window_bounds = array<i64: 80, 128>}, {transform_indices = @transform_1, window_bounds = array<i64: 128, 64>}, {transform_indices = @transform_2, window_bounds = array<i64: 16, 128>}]} {
    %c0 = arith.constant 0 : index
    %c0_0 = arith.constant 0 : index
    %0 = vector.load %arg1[%c0, %c0_0] : memref<80x128xf32, #tpu.memory_space<vmem>>, vector<32x64xf32>
    %c0_1 = arith.constant 0 : index
    %c64 = arith.constant 64 : index
    %1 = vector.load %arg1[%c0_1, %c64] : memref<80x128xf32, #tpu.memory_space<vmem>>, vector<32x1xf32>
    %c0_2 = arith.constant 0 : index
    %c65 = arith.constant 65 : index
    %2 = vector.load %arg1[%c0_2, %c65] : memref<80x128xf32, #tpu.memory_space<vmem>>, vector<32x1xf32>
    %c0_3 = arith.constant 0 : index
    %c66 = arith.constant 66 : index
    %3 = vector.load %arg1[%c0_3, %c66] : memref<80x128xf32, #tpu.memory_space<vmem>>, vector<32x1xf32>
    %c32 = arith.constant 32 : index
    %c0_4 = arith.constant 0 : index
    %4 = vector.load %arg1[%c32, %c0_4] : memref<80x128xf32, #tpu.memory_space<vmem>>, vector<32x32xf32>
    %c64_5 = arith.constant 64 : index
    %c0_6 = arith.constant 0 : index
    %5 = vector.load %arg1[%c64_5, %c0_6] : memref<80x128xf32, #tpu.memory_space<vmem>>, vector<16x32xf32>
    %c64_7 = arith.constant 64 : index
    %c64_8 = arith.constant 64 : index
    %6 = vector.load %arg1[%c64_7, %c64_8] : memref<80x128xf32, #tpu.memory_space<vmem>>, vector<16x1xf32>
    %c0_9 = arith.constant 0 : index
    %c0_10 = arith.constant 0 : index
    %7 = vector.load %arg2[%c0_9, %c0_10] : memref<128x64xf32, #tpu.memory_space<vmem>>, vector<128x64xf32>
    %8 = tpu.transpose %7, [1, 0] : vector<128x64xf32> -> vector<64x128xf32>
    %cst = arith.constant dense<0.000000e+00> : vector<32x128xf32>
    %9 = tpu.matmul %0, %8, %cst {dimension_numbers = #tpu.dot_dimension_numbers<[1], [0], [0], [1], [0, 0, 1, 1], [], []>} : vector<32x64xf32>, vector<64x128xf32>, vector<32x128xf32> -> vector<32x128xf32>
    %10 = vector.broadcast %1 : vector<32x1xf32> to vector<32x128xf32>
    %11 = arith.addf %9, %10 : vector<32x128xf32>
    %12 = arith.mulf %11, %11 : vector<32x128xf32>
    %cst_11 = arith.constant dense<0.000000e+00> : vector<32x128xf32>
    %13 = tpu.matmul %4, %12, %cst_11 {dimension_numbers = #tpu.dot_dimension_numbers<[1], [0], [0], [1], [0, 0, 1, 1], [], []>} : vector<32x32xf32>, vector<32x128xf32>, vector<32x128xf32> -> vector<32x128xf32>
    %cst_12 = arith.constant 9.99999974E-6 : f32
    %14 = vector.broadcast %cst_12 : f32 to vector<32x128xf32>
    %15 = arith.addf %13, %14 : vector<32x128xf32>
    %16 = math.rsqrt %15 : vector<32x128xf32>
    %17 = vector.broadcast %2 : vector<32x1xf32> to vector<32x128xf32>
    %18 = arith.mulf %17, %16 : vector<32x128xf32>
    %19 = arith.mulf %11, %18 : vector<32x128xf32>
    %20 = vector.broadcast %3 : vector<32x1xf32> to vector<32x128xf32>
    %21 = arith.addf %19, %20 : vector<32x128xf32>
    %cst_13 = arith.constant 0.000000e+00 : f32
    %22 = vector.broadcast %cst_13 : f32 to vector<32x128xf32>
    %23 = arith.maximumf %21, %22 : vector<32x128xf32>
    %cst_14 = arith.constant dense<0.000000e+00> : vector<16x128xf32>
    %24 = tpu.matmul %5, %23, %cst_14 {dimension_numbers = #tpu.dot_dimension_numbers<[1], [0], [0], [1], [0, 0, 1, 1], [], []>} : vector<16x32xf32>, vector<32x128xf32>, vector<16x128xf32> -> vector<16x128xf32>
    %25 = vector.broadcast %6 : vector<16x1xf32> to vector<16x128xf32>
    %26 = arith.addf %24, %25 : vector<16x128xf32>
    %cst_15 = arith.constant dense<0xFF800000> : vector<128xf32>
    %27 = vector.multi_reduction <maximumf>, %26, %cst_15 [0] : vector<16x128xf32> to vector<128xf32>
    %28 = vector.shape_cast %27 : vector<128xf32> to vector<1x128xf32>
    %29 = vector.broadcast %28 : vector<1x128xf32> to vector<16x128xf32>
    %30 = arith.subf %26, %29 : vector<16x128xf32>
    %31 = math.exp %30 : vector<16x128xf32>
    %cst_16 = arith.constant dense<0.000000e+00> : vector<128xf32>
    %32 = vector.multi_reduction <add>, %31, %cst_16 [0] : vector<16x128xf32> to vector<128xf32>
    %33 = vector.shape_cast %32 : vector<128xf32> to vector<1x128xf32>
    %34 = vector.broadcast %33 : vector<1x128xf32> to vector<16x128xf32>
    %35 = arith.divf %31, %34 : vector<16x128xf32>
    %c0_17 = arith.constant 0 : index
    %c0_18 = arith.constant 0 : index
    %36 = vector.load %arg3[%c0_17, %c0_18] : memref<16x128xf32, #tpu.memory_space<vmem>>, vector<16x128xf32>
    tpu.vector_store %arg3[%c0_17, %c0_18], %35 {strides = array<i32>} : memref<16x128xf32, #tpu.memory_space<vmem>>, vector<16x128xf32>,
    return
  }
  func.func @transform_0(%arg0: i32) -> (i32, i32) {
    %c0_i32 = arith.constant 0 : i32
    %c0_i32_0 = arith.constant 0 : i32
    %c0_i32_1 = arith.constant 0 : i32
    return %c0_i32, %c0_i32_0 : i32, i32
  }
  func.func @transform_1(%arg0: i32) -> (i32, i32) {
    %c0_i32 = arith.constant 0 : i32
    %c0_i32_0 = arith.constant 0 : i32
    return %arg0, %c0_i32 : i32, i32
  }
  func.func @transform_2(%arg0: i32) -> (i32, i32) {
    %c0_i32 = arith.constant 0 : i32
    %c0_i32_0 = arith.constant 0 : i32
    return %c0_i32, %arg0 : i32, i32
  }
}

</mosaic_0001>

<bundles_post_ra>
// kernel: tpu_custom_call.1
= control target key start
LH: loop header
LB: loop body
LE: loop exit
PB: predicated region body
PF: predicated region fallthrough
CT: control target
= control target key end

     0   :  { %7 = vsyncpa [#allocation3], 0  ;;  %s1179_s0 = inlined_call_operand.vmem [shape: f32[80,128], index: 0, kind: input, shape index: {}]   ;;  %s1180_s1 = inlined_call_operand.vmem [shape: f32[256,64], index: 1, kind: input, shape index: {}]   ;;  %s1181_s2 = inlined_call_operand.hbm [shape: f32[16,256], index: 2, kind: output, shape index: {}]  }
   0x1   :  { %9 = vsyncpa [#allocation3 + $0x1], 0  ;;  %s960_s9 = smov 0   ;;  %s962_s10 = smov 0  }
   0x2   :  { %s964_s11 = smov 0   ;;  %s966_s12 = smov 0  }
   0x3 LB: > { %s981_s13 = sadd.s32 4294967295, %s936_s12   ;;  %s675_s14 = sadd.s32 4294967294, %s936_s12   ;;  %s936_s12 = sphi %s966_s12, %s1187_s12   ;;  %s932_s11 = sphi %s964_s11, %s1186_s11   ;;  %s928_s10 = sphi %s962_s10, %s1185_s10   ;;  %s924_s9 = sphi %s960_s9, %s1184_s9  }
   0x4   : > { %s985_s15 = sadd.s32 1, %s936_s12   ;;  %s69_s16 = sadd.s32 1, %s932_s11 }
   0x5   : > { %s66_s17 = ssub.s32 %s936_s12, %s985_s15  ;;  %p79_p0 = scmp.ne.s32.totalorder %s932_s11, %s928_s10 }
   0x6   : > { %p67_p1 = scmp.eq.s32.totalorder %s66_s17, 0  ;;  %p80_p2 = scmp.eq.s32.totalorder %s981_s13, 1 }
   0x7   : > { %p85_p3 = scmp.ne.s32.totalorder %s928_s10, %s924_s9  ;;  %p86_p4 = scmp.eq.s32.totalorder %s675_s14, 1 }
   0x8   : > { %s996_s18 = scalar_select %p67_p1, %s932_s11, %s69_s16  }
   0x9   : > { %p998_p5 = por %p80_p2, %p79_p0  ;;  %p1002_p6 = por %p86_p4, %p85_p3 }
   0xa   : > { %p678_p7 = scmp.ge.s32.totalorder %s936_s12, 1  ;;  %p116_p8 = scmp.lt.s32.totalorder %s936_s12, 3 }
   0xc   : > { %p117_p9 = pnand %p678_p7, %p116_p8 }
   0xd   : > { %s680_s21 = sshll.u32 (!%p117_p9), %s981_s13, 4  ;;  %s135_s27 = sand.u32 (!%p117_p9), 1, %s928_s10  }
   0xe   : > { %120 = sbr.rel (%p117_p9) target bundleno = 800 (0x320), region = 28  ;;  %p139_p10 = scmp.lt.s32.totalorder (!%p117_p9), %s680_s21, 31 }
   0xf   : > { %s709_s29 = sshll.u32 (!%p117_p9), %s981_s13, 7  ;;  %s1139_s7 = scalar_lea.sflag (!%p117_p9), [#allocation3], %s135_s27 }
  0x10   : > { %s1135_s6 = scalar_lea.hbm (!%p117_p9), %s1181_s2, %s709_s29  ;;  %s941_s8 = smov (!%p117_p9), [#allocation2]  }
  0x11   : > { %s880_s14 = sshll.u32 (!%p117_p9), %s941_s8, 4  ;;  %s881_s14 = int_to_ptr.vmem [resolvable:$false] %s880_s14 }
  0x12   : > { %s882_s16 = scalar_lea.vmem (!%p117_p9), %s881_s14, 512 }
  0x13   : > { %vm190_vm0 = vcmask 523264   ;;  %v1012_v0 = vld [vmem:[%s1179_s0] sm:$0xff]  ;;  %v1019_v1 = vld [vmem:[%s1179_s0 + $0x8] sm:$0xff]  ;;  %v938_v2 = vmov 64   ;;  %v1025_v3 = vld [vmem:[%s1179_s0 + $0x18] sm:$0xff]  ;;  %s1189_s21 = smov (!%p139_p10, %s680_s21), 31 }
  0x14   : > { %778 = vmatprep.mubr.msk.f32.mxu0 %vm190_vm0, %v1012_v0  ;;  %855 = vset.pattern.permute.xlu1 %v938_v2  ;;  %s681_s28 = sshll.u32 %s1189_s21, 3  ;;  %v1038_v4 = vld [vmem:[%s1179_s0 + $0x10] sm:$0xff]  ;;  %v148_v21 = vld [vmem:[%s1179_s0 + $0x20] sm:$0xff]  ;;  %vm336_vm1 = vcmask 261120   ;;  %v939_v22 = vmov 65   ;;  %v940_v23 = vmov 66  }
  0x15   : > { %854 = vset.pattern.permute.xlu0 %v938_v2  ;;  %177 = vperm.xlu1 %855, %v1019_v1   ;;  %s1033_s3 = scalar_lea.vmem %s1180_s1, %s681_s28  ;;  %v149_v40 = vld [vmem:[%s1179_s0 + $0x28] sm:$0xff]  ;;  %v150_v41 = vld [vmem:[%s1179_s0 + $0x30] sm:$0xff]  ;;  %v151_v42 = vld [vmem:[%s1179_s0 + $0x38] sm:$0xff]  ;;  %s679_s28 = sshll.u32 %s135_s27, 4 }
  0x16   : > { %187 = vperm.xlu0 %854, %v1025_v3   ;;  %v169_v5 = vld [vmem:[%s1033_s3 + $0x78] sm:$0xff]  ;;  %v168_v6 = vld [vmem:[%s1033_s3 + $0x70] sm:$0xff]  ;;  %v167_v7 = vld [vmem:[%s1033_s3 + $0x68] sm:$0xff]  ;;  %792 = vmatprep.mubr.msk.f32.mxu1 %vm336_vm1, %v148_v21  ;;  %s137_s30 = scalar_lea.vmem [#allocation2], %s679_s28 }
  0x17   : > { %746 = vmatprep.subr.msk.mxu0 %vm190_vm0, %v169_v5  ;;  %v166_v8 = vld [vmem:[%s1033_s3 + $0x60] sm:$0xff]  ;;  %v165_v9 = vld [vmem:[%s1033_s3 + $0x58] sm:$0xff]  ;;  %v164_v10 = vld [vmem:[%s1033_s3 + $0x50] sm:$0xff] }
  0x18   : > { %747 = vmatpush3.xpose.msk.msra.mxu0 %vm190_vm0, %v169_v5  ;;  %v163_v11 = vld [vmem:[%s1033_s3 + $0x48] sm:$0xff]  ;;  %v162_v12 = vld [vmem:[%s1033_s3 + $0x40] sm:$0xff]  ;;  %v161_v13 = vld [vmem:[%s1033_s3 + $0x38] sm:$0xff] }
  0x19   : > { %172 = vperm.xlu1 %855, %v1012_v0   ;;  %748 = vmatprep.subr.msk.mxu0 %vm190_vm0, %v168_v6  ;;  %v160_v14 = vld [vmem:[%s1033_s3 + $0x30] sm:$0xff]  ;;  %v159_v15 = vld [vmem:[%s1033_s3 + $0x28] sm:$0xff]  ;;  %v158_v16 = vld [vmem:[%s1033_s3 + $0x20] sm:$0xff] }
  0x1a   : > { %182 = vperm.xlu0 %854, %v1038_v4   ;;  %v157_v17 = vld [vmem:[%s1033_s3 + $0x18] sm:$0xff]  ;;  %v156_v18 = vld [vmem:[%s1033_s3 + $0x10] sm:$0xff]  ;;  %v155_v19 = vld [vmem:[%s1033_s3 + $0x8] sm:$0xff] }
  0x1b   : > { %v154_v20 = vld [vmem:[%s1033_s3] sm:$0xff]  ;;  %v153_v44 = vld [vmem:[%s1179_s0 + $0x48] sm:$0xff]  ;;  %s613_s3 = sshll.u32 %s137_s30, 4  ;;  %s1137_s3 = int_to_ptr.vmem [resolvable:$true] %s613_s3 }
  0x1c   : > { %749 = vmatpush3.xpose.msk.msra.mxu0 %vm190_vm0, %v168_v6  ;;  %v152_v43 = vld [vmem:[%s1179_s0 + $0x40] sm:$0xff]  ;;  %s876_s13 = scalar_lea.vmem %s1137_s3, 256  ;;  %p883_p0 = scmp.lt.s32.totalorder %s1137_s3, %s881_s14 }
  0x1d   : > { %750 = vmatprep.subr.msk.mxu0 %vm190_vm0, %v167_v7  ;;  %857 = vset.pattern.permute.xlu1 %v939_v22  ;;  %p877_p11 = scmp.ne.s32.totalorder %s1137_s3, %s876_s13  ;;  %p884_p1 = scmp.lt.s32.totalorder %s882_s16, %s876_s13 }
  0x1e   : > { %856 = vset.pattern.permute.xlu0 %v939_v22  ;;  %447 = vperm.xlu1 %857, %v1038_v4  }
  0x1f   : > { %451 = vperm.xlu0 %856, %v1025_v3   ;;  %p878_p12 = pnand %p877_p11, %p998_p5  ;;  %p885_p2 = por %p884_p1, %p883_p0 }
  0x20   : > { %751 = vmatpush3.xpose.msk.msra.mxu0 %vm190_vm0, %v167_v7 }
  0x21   : > { %752 = vmatprep.subr.msk.mxu0 %vm190_vm0, %v166_v8  ;;  %p879_p13 = pneg %p878_p12 }
  0x22   : > { %443 = vperm.xlu1 %857, %v1019_v1  }
  0x23   : > { %858 = vset.pattern.permute.xlu0 %v940_v23  ;;  %p886_p3 = pnand %p885_p2, %p879_p13 }
  0x24   : > { %753 = vmatpush3.xpose.msk.msra.mxu0 %vm190_vm0, %v166_v8  ;;  %475 = vperm.xlu0 %858, %v1025_v3  }
  0x25   : > { %754 = vmatprep.subr.msk.mxu0 %vm190_vm0, %v165_v9 }
  0x26   : > { %439 = vperm.xlu1 %857, %v1012_v0  }
  0x28   : > { %755 = vmatpush3.xpose.msk.msra.mxu0 %vm190_vm0, %v165_v9  ;;  %467 = vperm.xlu0 %858, %v1019_v1  }
  0x29   : > { %756 = vmatprep.subr.msk.mxu0 %vm190_vm0, %v164_v10 }
  0x2a   : > { %859 = vset.pattern.permute.xlu1 %v940_v23 }
  0x2b   : > { %471 = vperm.xlu1 %859, %v1038_v4  }
  0x2c   : > { %757 = vmatpush3.xpose.msk.msra.mxu0 %vm190_vm0, %v164_v10  ;;  %860 = vset.pattern.permute.xlu0 %v938_v2 }
  0x2d   : > { %758 = vmatprep.subr.msk.mxu0 %vm190_vm0, %v163_v11  ;;  %488 = vperm.xlu0 %860, %v152_v43  }
  0x2f   : > { %463 = vperm.xlu1 %859, %v1012_v0  }
  0x30   : > { %759 = vmatpush3.xpose.msk.msra.mxu0 %vm190_vm0, %v163_v11 }
  0x31   : > { %760 = vmatprep.subr.msk.mxu0 %vm190_vm0, %v162_v12 }
  0x33   : > { %861 = vset.pattern.permute.xlu1 %v938_v2 }
  0x34   : > { %761 = vmatpush3.xpose.msk.msra.mxu0 %vm190_vm0, %v162_v12  ;;  %493 = vperm.xlu1 %861, %v153_v44  }
  0x35   : > { %762 = vmatprep.subr.msk.mxu0 %vm190_vm0, %v161_v13 }
  0x38   : > { %763 = vmatpush3.xpose.msk.msra.mxu0 %vm190_vm0, %v161_v13 }
  0x39   : > { %764 = vmatprep.subr.msk.mxu0 %vm190_vm0, %v160_v14 }
  0x3c   : > { %765 = vmatpush3.xpose.msk.msra.mxu0 %vm190_vm0, %v160_v14 }
  0x3d   : > { %766 = vmatprep.subr.msk.mxu0 %vm190_vm0, %v159_v15 }
  0x40   : > { %767 = vmatpush3.xpose.msk.msra.mxu0 %vm190_vm0, %v159_v15 }
  0x41   : > { %768 = vmatprep.subr.msk.mxu0 %vm190_vm0, %v158_v16 }
  0x44   : > { %769 = vmatpush3.xpose.msk.msra.mxu0 %vm190_vm0, %v158_v16 }
  0x45   : > { %770 = vmatprep.subr.msk.mxu0 %vm190_vm0, %v157_v17 }
  0x48   : > { %771 = vmatpush3.xpose.msk.msra.mxu0 %vm190_vm0, %v157_v17 }
  0x49   : > { %772 = vmatprep.subr.msk.mxu0 %vm190_vm0, %v156_v18 }
  0x4c   : > { %773 = vmatpush3.xpose.msk.msra.mxu0 %vm190_vm0, %v156_v18 }
  0x4d   : > { %774 = vmatprep.subr.msk.mxu0 %vm190_vm0, %v155_v19 }
  0x50   : > { %775 = vmatpush3.xpose.msk.msra.mxu0 %vm190_vm0, %v155_v19 }
  0x51   : > { %776 = vmatprep.subr.msk.mxu0 %vm190_vm0, %v154_v20 }
  0x54   : > { %777 = vmatpush3.xpose.msk.msra.mxu0 %vm190_vm0, %v154_v20 }
  0x57   : > { %779 = vmatmul.mubr.msk.f32.vlgmr.msra.gmra.mxu0 %vm190_vm0, %v1019_v1 }
  0x58   : > { %781 = vmatprep.mubr.msk.f32.mxu0 %vm190_vm0, %v1038_v4 }
  0x5b   : > { %782 = vmatmul.mubr.msk.f32.gmra.mxu0 %vm190_vm0, %v1025_v3 }
  0x90   : > { %v178_v25 = vpop.permute.xlu1 %177 }
  0x91   : > { %v188_v24 = vpop.permute.xlu0 %187 }
  0x94   : > { %v173_v31 = vpop.permute.xlu1 %172 }
  0x95   : > { %v183_v29 = vpop.permute.xlu0 %182 }
  0x99   : > { %v448_v48 = vpop.permute.xlu1 %447 }
  0x9a   : > { %v452_v55 = vpop.permute.xlu0 %451 }
  0x9d   : > { %v444_v54 = vpop.permute.xlu1 %443 }
  0x9f   : > { %v476_v59 = vpop.permute.xlu0 %475 }
  0xa1   : > { %v440_v56 = vpop.permute.xlu1 %439 }
  0xa3   : > { %v468_v5 = vpop.permute.xlu0 %467 }
  0xa6   : > { %v472_v62 = vpop.permute.xlu1 %471 }
  0xa8   : > { %v489_v19 = vpop.permute.xlu0 %488 }
  0xaa   : > { %v464_v9 = vpop.permute.xlu1 %463 }
  0xaf   : > { %v494_v17 = vpop.permute.xlu1 %493 }
 0x117   : > { %v780_v26 = vpop.f32.mrf.mxu0 }
 0x118   : > { %v319_v33 = vadd.f32 %v780_v26, %v178_v25 }
 0x119   : > { %v313_v27 = vpop.f32.mrf.mxu0 }
 0x11a   : > { %v314_v36 = vadd.f32 %v313_v27, %v173_v31  ;;  %v333_v38 = vmul.f32 %v319_v33, %v319_v33 }
 0x11b   : > { %v783_v28 = vpop.f32.mrf.mxu0 }
 0x11c   : > { %v329_v30 = vadd.f32 %v783_v28, %v188_v24  ;;  %v332_v39 = vmul.f32 %v314_v36, %v314_v36 }
 0x11d   : > { %v323_v32 = vpop.f32.mrf.mxu0 }
 0x11e   : > { %v324_v34 = vadd.f32 %v323_v32, %v183_v29  ;;  %v335_v35 = vmul.f32 %v329_v30, %v329_v30 }
 0x120   : > { %v334_v37 = vmul.f32 %v324_v34, %v324_v34  ;;  %784 = vmatprep.subr.mxu1 %v335_v35 }
 0x121   : > { %785 = vmatpush3.msra.mxu1 %v335_v35 }
 0x122   : > { %786 = vmatprep.subr.mxu1 %v334_v37 }
 0x123   : > { %787 = vmatpush3.msra.mxu1 %v334_v37 }
 0x124   : > { %788 = vmatprep.subr.mxu1 %v333_v38 }
 0x125   : > { %789 = vmatpush3.msra.mxu1 %v333_v38 }
 0x126   : > { %790 = vmatprep.subr.mxu1 %v332_v39 }
 0x127   : > { %791 = vmatpush3.msra.mxu1 %v332_v39 }
 0x128   : > { %793 = vmatmul.mubr.msk.f32.vlgmr.msra.gmra.mxu1 %vm336_vm1, %v149_v40 }
 0x129   : > { %795 = vmatprep.mubr.msk.f32.mxu1 %vm336_vm1, %v150_v41 }
 0x12c   : > { %796 = vmatmul.mubr.msk.f32.gmra.mxu1 %vm336_vm1, %v151_v42 }
 0x12d   : > { %806 = vmatprep.mubr.msk.f32.mxu1 %vm336_vm1, %v152_v43 }
 0x1e8   : > { %v794_v45 = vpop.f32.mrf.mxu1 }
 0x1e9   : > { %v421_v46 = vadd.f32 1e-05, %v794_v45 }
 0x1ea   : > { %v415_v47 = vpop.f32.mrf.mxu1 }
 0x1eb   : > { %862 = vrsqrt.f32 %v421_v46  ;;  %v416_v49 = vadd.f32 1e-05, %v415_v47 }
 0x1ec   : > { %v797_v50 = vpop.f32.mrf.mxu1 }
 0x1ed   : > { %864 = vrsqrt.f32 %v416_v49  ;;  %v431_v51 = vadd.f32 1e-05, %v797_v50 }
 0x1ee   : > { %v425_v52 = vpop.f32.mrf.mxu1 }
 0x1ef   : > { %866 = vrsqrt.f32 %v431_v51  ;;  %v426_v53 = vadd.f32 1e-05, %v425_v52 }
 0x1f1   : > { %868 = vrsqrt.f32 %v426_v53 }
 0x1f8   : > { %v863_v57 = vpop.eup %862 }
 0x1f9   : > { %v455_v60 = vmul.f32 %v863_v57, %v444_v54 }
 0x1fa   : > { %v865_v58 = vpop.eup %864 }
 0x1fb   : > { %v454_v0 = vmul.f32 %v865_v58, %v440_v56  ;;  %v459_v4 = vmul.f32 %v455_v60, %v319_v33 }
 0x1fc   : > { %v867_v61 = vpop.eup %866 }
 0x1fd   : > { %v457_v63 = vmul.f32 %v867_v61, %v452_v55  ;;  %v458_v8 = vmul.f32 %v454_v0, %v314_v36  ;;  %v479_v12 = vadd.f32 %v468_v5, %v459_v4 }
 0x1fe   : > { %v869_v1 = vpop.eup %868 }
 0x1ff   : > { %v461_v2 = vmul.f32 %v457_v63, %v329_v30  ;;  %v456_v3 = vmul.f32 %v869_v1, %v448_v48  ;;  %v478_v14 = vadd.f32 %v464_v9, %v458_v8  ;;  %v483_v15 = vmax.f32 %v479_v12, 0.0 }
 0x201   : > { %v481_v6 = vadd.f32 %v476_v59, %v461_v2  ;;  %v460_v7 = vmul.f32 %v456_v3, %v324_v34  ;;  %v482_v16 = vmax.f32 %v478_v14, 0.0 }
 0x203   : > { %v485_v10 = vmax.f32 %v481_v6, 0.0  ;;  %v480_v11 = vadd.f32 %v472_v62, %v460_v7 }
 0x205   : > { %v484_v13 = vmax.f32 %v480_v11, 0.0  ;;  %798 = vmatprep.subr.mxu1 %v485_v10 }
 0x206   : > { %799 = vmatpush3.msra.mxu1 %v485_v10 }
 0x207   : > { %800 = vmatprep.subr.mxu1 %v484_v13 }
 0x208   : > { %801 = vmatpush3.msra.mxu1 %v484_v13 }
 0x209   : > { %802 = vmatprep.subr.mxu1 %v483_v15 }
 0x20a   : > { %803 = vmatpush3.msra.mxu1 %v483_v15 }
 0x20b   : > { %804 = vmatprep.subr.mxu1 %v482_v16 }
 0x20c   : > { %805 = vmatpush3.msra.mxu1 %v482_v16 }
 0x20d   : > { %807 = vmatmul.mubr.msk.f32.vlgmr.msra.gmra.mxu1 %vm336_vm1, %v153_v44 }
 0x2cd   : > { %v808_v18 = vpop.f32.mrf.mxu1 }
 0x2ce   : > { %v572_v21 = vadd.f32 %v808_v18, %v494_v17 }
 0x2cf   : > { %v566_v20 = vpop.f32.mrf.mxu1 }
 0x2d0   : > { %v567_v22 = vadd.f32 %v566_v20, %v489_v19 }
 0x2d2   : > { %v575_v23 = vmax.f32 %v567_v22, %v572_v21 }
 0x2d4   : > { %v576_v24 = vrot.slane %v575_v23, 4 }
 0x2d6   : > { %v577_v25 = vmax.f32 %v575_v23, %v576_v24 }
 0x2d8   : > { %v578_v26 = vrot.slane %v577_v25, 2 }
 0x2da   : > { %v579_v27 = vmax.f32 %v577_v25, %v578_v26 }
 0x2dc   : > { %v580_v28 = vrot.slane %v579_v27, 1 }
 0x2de   : > { %v581_v29 = vmax.f32 %v579_v27, %v580_v28 }
 0x2e0   : > { %v582_v30 = vsub.f32 %v567_v22, %v581_v29  ;;  %v583_v31 = vsub.f32 %v572_v21, %v581_v29 }
 0x2e2   : > { %v584_v32 = vmul.f32 1.442695, %v582_v30  ;;  %v586_v33 = vmul.f32 1.442695, %v583_v31 }
 0x2e4   : > { %870 = vpow2.f32 %v584_v32 }
 0x2e5   : > { %872 = vpow2.f32 %v586_v33 }
 0x2f1   : > { %v871_v34 = vpop.eup %870 }
 0x2f2   : > { %v873_v35 = vpop.eup %872 }
 0x2f3   : > { %v588_v36 = vadd.f32 %v873_v35, %v871_v34 }
 0x2f5   : > { %v589_v37 = vrot.slane %v588_v36, 4 }
 0x2f7   : > { %v590_v38 = vadd.f32 %v589_v37, %v588_v36 }
 0x2f9   : > { %v591_v39 = vrot.slane %v590_v38, 2 }
 0x2fb   : > { %v592_v40 = vadd.f32 %v591_v39, %v590_v38 }
 0x2fd   : > { %v593_v41 = vrot.slane %v592_v40, 1 }
 0x2ff   : > { %v594_v42 = vadd.f32 %v593_v41, %v592_v40 }
 0x301   : > { %874 = vrcp.f32 %v594_v42 }
 0x30e   : > { %v875_v43 = vpop.eup %874 }
 0x30f   : > { %v596_v44 = vmul.f32 %v875_v43, %v871_v34  ;;  %v597_v45 = vmul.f32 %v875_v43, %v873_v35 }
 0x311   : > { %598 = vst [vmem:[%s137_s30] sm:$0xff] %v596_v44  ;;  %599 = vst [vmem:[%s137_s30 + $0x8] sm:$0xff] %v597_v45 }
 0x312   : > { %889 = shalt.err (!%p886_p3)
}
 0x313   : > { %s890_s17 = scalar_lea.hbm %s1135_s6, 256  ;;  %s894_s23 = scalar_lea.hbm %s1181_s2, 512 }
 0x314   : > { %p891_p4 = scmp.ne.s32.totalorder %s1135_s6, %s890_s17  ;;  %p895_p9 = scmp.lt.s32.totalorder %s1135_s6, %s1181_s2 }
 0x315   : > { %p896_p10 = scmp.lt.s32.totalorder %s894_s23, %s890_s17 }
 0x316   : > { %p892_p7 = pnand %p891_p4, %p998_p5 }
 0x317   : > { %p897_p11 = por %p896_p10, %p895_p9 }
 0x318   : > { %p893_p8 = pneg %p892_p7 }
 0x31a   : > { %p898_p12 = pnand %p897_p11, %p893_p8 }
 0x31c   : > { %901 = shalt.err (!%p898_p12)
}
 0x31d   : > { %s942_s26 = smov 128   ;;  %s943_s27 = smov 256  }
 0x31e   : > { %s944_s28 = smov 8  }
 0x31f   : > { %809 = dma.vmem_to_hbm [thread:$0]  (%p998_p5), %s1137_s3, 256, %s1135_s6, %s1139_s7, %s942_s26, %s943_s27, %s944_s28  }
 0x320 PF: > { %p815_p13 = scmp.ge.s32.totalorder %s936_s12, 2  ;;  %s628_s29 = sand.u32 1, %s924_s9  }
 0x321   : > { %s629_s30 = scalar_lea.sflag [#allocation3], %s628_s29 }
 0x322   : > { %p812_p0 = pnand %p815_p13, %p1002_p6 }
 0x324   : > { %p813_p1 = pneg %p812_p0 }
 0x326   : > { %919 = dma.done.wait (%p813_p1), %s629_s30, 256  }
 0x327   : > { %921 = vsyncadd (%p813_p1), %s629_s30, 4294967040  ;;  %p12_p2 = scmp.ge.s32.totalorder %s985_s15, 4   ;;  %s1184_s9 = smov %s928_s10 }
 0x328   : > { %s1185_s10 = smov %s932_s11  ;;  %s1186_s11 = smov %s996_s18 }
 0x329   : > { %s1187_s12 = smov %s985_s15  ;;  %14 = sbr.rel (!%p12_p2) target bundleno = 3 (0x3), region = 63 }
 0x32e   :  { %634 = vsyncpa [#allocation3], 1 }
 0x32f   :  { %636 = vsyncpa [#allocation3 + $0x1], 1 }

</bundles_post_ra>
